<compile_context>
chip_gen: v7x
topology: tpu7x:2x2x1
jax: 0.10.0
libtpu: 0.0.40
codegen_flags: <defaults>
</compile_context>

<pallas_src>
import math
import functools

import jax
import jax.numpy as jnp
from jax import lax
from jax.experimental import pallas as pl
from jax.experimental.pallas import tpu as pltpu


# ---------------------------------------------------------------------------
# Fused kernel: one (batch, Sq-tile) step computes QKV for all heads, per-head
# softmax-attention, lane-dense concat and the W_O projection.
# ---------------------------------------------------------------------------
def _mha_fused_kernel(xto_ref, xfrom_ref, wq_ref, bq_ref, wk_ref, bk_ref,
                      wv_ref, bv_ref, wo_ref, bo_ref, out_ref,
                      *, n_heads, dph, compute_dtype):
    cd = compute_dtype
    x_to = xto_ref[0].astype(cd)        # (tq, Dto)
    x_from = xfrom_ref[0].astype(cd)    # (Sk, Dfrom)

    # Fused projections for all heads at once (weights already in compute dtype,
    # 1/sqrt(dph) scale already folded into wq/bq). f32 accumulation.
    q = jnp.dot(x_to, wq_ref[...], preferred_element_type=jnp.float32) + bq_ref[...]
    k = jnp.dot(x_from, wk_ref[...], preferred_element_type=jnp.float32) + bk_ref[...]
    v = jnp.dot(x_from, wv_ref[...], preferred_element_type=jnp.float32) + bv_ref[...]

    # Per-head scaled dot-product attention (static loop over heads).
    ctxs = []
    for h in range(n_heads):
        lo = h * dph
        qh = q[:, lo:lo + dph].astype(cd)     # (tq, dph)
        kh = k[:, lo:lo + dph].astype(cd)     # (Sk, dph)
        vh = v[:, lo:lo + dph].astype(cd)     # (Sk, dph)

        # q @ k^T without an explicit transpose: contract last dims on the MXU.
        sim = lax.dot_general(qh, kh, (((1,), (1,)), ((), ())),
                              preferred_element_type=jnp.float32)  # (tq, Sk)

        # Numerically stable softmax (all stats in f32).
        m = jnp.max(sim, axis=-1, keepdims=True)
        p = jnp.exp(sim - m)
        inv = pl.reciprocal(jnp.sum(p, axis=-1, keepdims=True), approx=True)
        attn = (p * inv).astype(cd)

        ctxs.append(jnp.dot(attn, vh, preferred_element_type=jnp.float32))  # (tq, dph)

    # Lane-dense concat of head outputs (heads along the last dim) -> (tq, H).
    concat = jnp.concatenate(ctxs, axis=-1)

    # Fused output projection W_O.
    y = jnp.dot(concat.astype(cd), wo_ref[...],
                preferred_element_type=jnp.float32) + bo_ref[...]
    out_ref[0] = y.astype(out_ref.dtype)


# ---------------------------------------------------------------------------
# Parameter fusion (done once at setup, outside the kernel).
# ---------------------------------------------------------------------------
def fuse_params(params, n_heads, compute_dtype=jnp.bfloat16):
    """Stack per-head weights column-wise (matches torch.cat head order), fold the
    1/sqrt(dph) scale into W_Q/b_Q, and cast matmul weights to the compute dtype."""
    wq, bq = params["wq"], params["bq"]   # (nh, Dto, dph), (nh, dph)
    wk, bk = params["wk"], params["bk"]
    wv, bv = params["wv"], params["bv"]
    wo, bo = params["wo"], params["bo"]   # (H, H), (H,)
    dph = wq.shape[-1]
    H = n_heads * dph
    scale = 1.0 / math.sqrt(dph)

    def stack(w):  # (nh, D, dph) -> (D, nh*dph), head h -> columns [h*dph:(h+1)*dph]
        return jnp.transpose(w, (1, 0, 2)).reshape(w.shape[1], H)

    return {
        "wq": (stack(wq) * scale).astype(compute_dtype),
        "bq": (bq.reshape(1, H) * scale).astype(jnp.float32),
        "wk": stack(wk).astype(compute_dtype),
        "bk": bk.reshape(1, H).astype(jnp.float32),
        "wv": stack(wv).astype(compute_dtype),
        "bv": bv.reshape(1, H).astype(jnp.float32),
        "wo": wo.astype(compute_dtype),
        "bo": bo.reshape(1, H).astype(jnp.float32),
    }


def _pick_q_tile(sq, cap=512):
    if sq <= cap:
        return sq
    for t in range(cap, 7, -8):
        if sq % t == 0:
            return t
    return sq


def multi_head_attention(x_to, x_from, fused, *, n_heads,
                         compute_dtype=jnp.bfloat16):
    """x_to: (B, Sq, Dto), x_from: (B, Sk, Dfrom) -> (B, Sq, hidden_dim)."""
    B, Sq, Dto = x_to.shape
    _, Sk, Dfrom = x_from.shape
    H = fused["wq"].shape[-1]
    dph = H // n_heads

    tq = _pick_q_tile(Sq)
    n_q = Sq // tq

    kernel = functools.partial(_mha_fused_kernel, n_heads=n_heads, dph=dph,
                               compute_dtype=compute_dtype)

    return pl.pallas_call(
        kernel,
        out_shape=jax.ShapeDtypeStruct((B, Sq, H), x_to.dtype),
        grid_spec=pltpu.PrefetchScalarGridSpec(
            num_scalar_prefetch=0,
            grid=(B, n_q),
            in_specs=[
                pl.BlockSpec((1, tq, Dto), lambda b, i: (b, i, 0)),     # x_to tile
                pl.BlockSpec((1, Sk, Dfrom), lambda b, i: (b, 0, 0)),   # x_from (resident per b)
                pl.BlockSpec((Dto, H), lambda b, i: (0, 0)),            # W_Q (resident)
                pl.BlockSpec((1, H), lambda b, i: (0, 0)),              # b_Q
                pl.BlockSpec((Dfrom, H), lambda b, i: (0, 0)),          # W_K
                pl.BlockSpec((1, H), lambda b, i: (0, 0)),              # b_K
                pl.BlockSpec((Dfrom, H), lambda b, i: (0, 0)),          # W_V
                pl.BlockSpec((1, H), lambda b, i: (0, 0)),              # b_V
                pl.BlockSpec((H, H), lambda b, i: (0, 0)),              # W_O
                pl.BlockSpec((1, H), lambda b, i: (0, 0)),              # b_O
            ],
            out_specs=pl.BlockSpec((1, tq, H), lambda b, i: (b, i, 0)),  # lane-dense
        ),
        compiler_params=pltpu.CompilerParams(
            dimension_semantics=("parallel", "parallel"),
            vmem_limit_bytes=32 * 1024 * 1024,
        ),
    )(x_to, x_from,
      fused["wq"], fused["bq"], fused["wk"], fused["bk"],
      fused["wv"], fused["bv"], fused["wo"], fused["bo"])


# --- pure-JAX f32 reference matching the torch forward ---
def _reference(x_to, x_from, params, n_heads):
    wq, bq, wk, bk, wv, bv, wo, bo = (
        params["wq"], params["bq"], params["wk"], params["bk"],
        params["wv"], params["bv"], params["wo"], params["bo"],
    )
    dph = wq.shape[-1]
    outs = []
    for h in range(n_heads):
        Q = x_to @ wq[h] + bq[h]
        K = x_from @ wk[h] + bk[h]
        V = x_from @ wv[h] + bv[h]
        sim = jnp.einsum("bqd,bkd->bqk", Q, K) / math.sqrt(dph)
        attn = jax.nn.softmax(sim, axis=-1)
        outs.append(jnp.einsum("bqk,bkd->bqd", attn, V))
    concat = jnp.concatenate(outs, axis=-1)
    return concat @ wo + bo


if __name__ == "__main__":
    # small, module-consistent shapes
    B, Sq, Sk = 2, 8, 8
    x_to_dim, x_from_dim = 16, 16
    hidden_dim, n_heads = 32, 4
    dph = hidden_dim // n_heads

    key = jax.random.PRNGKey(0)
    ks = jax.random.split(key, 10)
    scale = 0.1
    params = {
        "wq": scale * jax.random.normal(ks[0], (n_heads, x_to_dim, dph), jnp.float32),
        "bq": scale * jax.random.normal(ks[1], (n_heads, dph), jnp.float32),
        "wk": scale * jax.random.normal(ks[2], (n_heads, x_from_dim, dph), jnp.float32),
        "bk": scale * jax.random.normal(ks[3], (n_heads, dph), jnp.float32),
        "wv": scale * jax.random.normal(ks[4], (n_heads, x_from_dim, dph), jnp.float32),
        "bv": scale * jax.random.normal(ks[5], (n_heads, dph), jnp.float32),
        "wo": scale * jax.random.normal(ks[6], (hidden_dim, hidden_dim), jnp.float32),
        "bo": scale * jax.random.normal(ks[7], (hidden_dim,), jnp.float32),
    }
    x_to = jax.random.normal(ks[8], (B, Sq, x_to_dim), jnp.float32)
    x_from = jax.random.normal(ks[9], (B, Sk, x_from_dim), jnp.float32)

    fused = fuse_params(params, n_heads, compute_dtype=jnp.bfloat16)
    out = multi_head_attention(x_to, x_from, fused, n_heads=n_heads,
                               compute_dtype=jnp.bfloat16)
    out = jax.block_until_ready(out)

    ref = _reference(x_to, x_from, params, n_heads)
    assert out.shape == (B, Sq, hidden_dim)
    max_err = float(jnp.max(jnp.abs(out - ref)))
    # bf16 matmul operands + approx reciprocal -> slightly looser tolerance vs f32 ref.
    assert jnp.allclose(out, ref, atol=2e-2, rtol=2e-2), f"mismatch vs reference (max abs err {max_err})"
    print("KERNEL_OK")
</pallas_src>

<mosaic_0001>
module attributes {stable_mosaic.version = 11 : i64} {
  func.func @_mha_fused_kernel(%arg0: i32, %arg1: i32, %arg2: memref<1x8x16xf32, #tpu.memory_space<vmem>>, %arg3: memref<1x8x16xf32, #tpu.memory_space<vmem>>, %arg4: memref<16x32xbf16, #tpu.memory_space<vmem>>, %arg5: memref<1x32xf32, #tpu.memory_space<vmem>>, %arg6: memref<16x32xbf16, #tpu.memory_space<vmem>>, %arg7: memref<1x32xf32, #tpu.memory_space<vmem>>, %arg8: memref<16x32xbf16, #tpu.memory_space<vmem>>, %arg9: memref<1x32xf32, #tpu.memory_space<vmem>>, %arg10: memref<32x32xbf16, #tpu.memory_space<vmem>>, %arg11: memref<1x32xf32, #tpu.memory_space<vmem>>, %arg12: memref<1x8x32xf32, #tpu.memory_space<vmem>>) attributes {dimension_semantics = [#tpu.dimension_semantics<parallel>, #tpu.dimension_semantics<parallel>], iteration_bounds = array<i64: 2, 1>, scalar_prefetch = 0 : i64, scratch_operands = 0 : i64, tpu.core_type = #tpu.core_type<tc>, window_params = [{transform_indices = @transform_0, window_bounds = array<i64: 1, 8, 16>}, {transform_indices = @transform_1, window_bounds = array<i64: 1, 8, 16>}, {pipeline_mode = #tpu.pipeline_mode<synchronous>, transform_indices = @transform_2, window_bounds = array<i64: 16, 32>}, {pipeline_mode = #tpu.pipeline_mode<synchronous>, transform_indices = @transform_3, window_bounds = array<i64: 1, 32>}, {pipeline_mode = #tpu.pipeline_mode<synchronous>, transform_indices = @transform_4, window_bounds = array<i64: 16, 32>}, {pipeline_mode = #tpu.pipeline_mode<synchronous>, transform_indices = @transform_5, window_bounds = array<i64: 1, 32>}, {pipeline_mode = #tpu.pipeline_mode<synchronous>, transform_indices = @transform_6, window_bounds = array<i64: 16, 32>}, {pipeline_mode = #tpu.pipeline_mode<synchronous>, transform_indices = @transform_7, window_bounds = array<i64: 1, 32>}, {pipeline_mode = #tpu.pipeline_mode<synchronous>, transform_indices = @transform_8, window_bounds = array<i64: 32, 32>}, {pipeline_mode = #tpu.pipeline_mode<synchronous>, transform_indices = @transform_9, window_bounds = array<i64: 1, 32>}, {transform_indices = @transform_10, window_bounds = array<i64: 1, 8, 32>}]} {
    %c0 = arith.constant 0 : index
    %c0_0 = arith.constant 0 : index
    %c0_1 = arith.constant 0 : index
    %0 = vector.load %arg2[%c0, %c0_0, %c0_1] : memref<1x8x16xf32, #tpu.memory_space<vmem>>, vector<1x8x16xf32>
    %1 = vector.shape_cast %0 : vector<1x8x16xf32> to vector<8x16xf32>
    %2 = arith.truncf %1 : vector<8x16xf32> to vector<8x16xbf16>
    %c0_2 = arith.constant 0 : index
    %c0_3 = arith.constant 0 : index
    %c0_4 = arith.constant 0 : index
    %3 = vector.load %arg3[%c0_2, %c0_3, %c0_4] : memref<1x8x16xf32, #tpu.memory_space<vmem>>, vector<1x8x16xf32>
    %4 = vector.shape_cast %3 : vector<1x8x16xf32> to vector<8x16xf32>
    %5 = arith.truncf %4 : vector<8x16xf32> to vector<8x16xbf16>
    %c0_5 = arith.constant 0 : index
    %c0_6 = arith.constant 0 : index
    %6 = vector.load %arg4[%c0_5, %c0_6] : memref<16x32xbf16, #tpu.memory_space<vmem>>, vector<16x32xbf16>
    %cst = arith.constant dense<0.000000e+00> : vector<8x32xf32>
    %7 = tpu.matmul %2, %6, %cst {dimension_numbers = #tpu.dot_dimension_numbers<[1], [0], [0], [1], [0, 0, 1, 1], [], []>} : vector<8x16xbf16>, vector<16x32xbf16>, vector<8x32xf32> -> vector<8x32xf32>
    %c0_7 = arith.constant 0 : index
    %c0_8 = arith.constant 0 : index
    %8 = vector.load %arg5[%c0_7, %c0_8] : memref<1x32xf32, #tpu.memory_space<vmem>>, vector<1x32xf32>
    %9 = vector.broadcast %8 : vector<1x32xf32> to vector<8x32xf32>
    %10 = arith.addf %7, %9 : vector<8x32xf32>
    %c0_9 = arith.constant 0 : index
    %c0_10 = arith.constant 0 : index
    %11 = vector.load %arg6[%c0_9, %c0_10] : memref<16x32xbf16, #tpu.memory_space<vmem>>, vector<16x32xbf16>
    %cst_11 = arith.constant dense<0.000000e+00> : vector<8x32xf32>
    %12 = tpu.matmul %5, %11, %cst_11 {dimension_numbers = #tpu.dot_dimension_numbers<[1], [0], [0], [1], [0, 0, 1, 1], [], []>} : vector<8x16xbf16>, vector<16x32xbf16>, vector<8x32xf32> -> vector<8x32xf32>
    %c0_12 = arith.constant 0 : index
    %c0_13 = arith.constant 0 : index
    %13 = vector.load %arg7[%c0_12, %c0_13] : memref<1x32xf32, #tpu.memory_space<vmem>>, vector<1x32xf32>
    %14 = vector.broadcast %13 : vector<1x32xf32> to vector<8x32xf32>
    %15 = arith.addf %12, %14 : vector<8x32xf32>
    %c0_14 = arith.constant 0 : index
    %c0_15 = arith.constant 0 : index
    %16 = vector.load %arg8[%c0_14, %c0_15] : memref<16x32xbf16, #tpu.memory_space<vmem>>, vector<16x32xbf16>
    %cst_16 = arith.constant dense<0.000000e+00> : vector<8x32xf32>
    %17 = tpu.matmul %5, %16, %cst_16 {dimension_numbers = #tpu.dot_dimension_numbers<[1], [0], [0], [1], [0, 0, 1, 1], [], []>} : vector<8x16xbf16>, vector<16x32xbf16>, vector<8x32xf32> -> vector<8x32xf32>
    %c0_17 = arith.constant 0 : index
    %c0_18 = arith.constant 0 : index
    %18 = vector.load %arg9[%c0_17, %c0_18] : memref<1x32xf32, #tpu.memory_space<vmem>>, vector<1x32xf32>
    %19 = vector.broadcast %18 : vector<1x32xf32> to vector<8x32xf32>
    %20 = arith.addf %17, %19 : vector<8x32xf32>
    %21 = vector.extract_strided_slice %10 {offsets = [0, 0], sizes = [8, 8], strides = [1, 1]} : vector<8x32xf32> to vector<8x8xf32>
    %22 = arith.truncf %21 : vector<8x8xf32> to vector<8x8xbf16>
    %23 = vector.extract_strided_slice %15 {offsets = [0, 0], sizes = [8, 8], strides = [1, 1]} : vector<8x32xf32> to vector<8x8xf32>
    %24 = arith.truncf %23 : vector<8x8xf32> to vector<8x8xbf16>
    %25 = vector.extract_strided_slice %20 {offsets = [0, 0], sizes = [8, 8], strides = [1, 1]} : vector<8x32xf32> to vector<8x8xf32>
    %26 = arith.truncf %25 : vector<8x8xf32> to vector<8x8xbf16>
    %cst_19 = arith.constant dense<0.000000e+00> : vector<8x8xf32>
    %27 = tpu.matmul %22, %24, %cst_19 {dimension_numbers = #tpu.dot_dimension_numbers<[1], [1], [0], [0], [0, 0, 1, 0], [], []>} : vector<8x8xbf16>, vector<8x8xbf16>, vector<8x8xf32> -> vector<8x8xf32>
    %cst_20 = arith.constant dense<0xFF800000> : vector<8xf32>
    %28 = vector.multi_reduction <maximumf>, %27, %cst_20 [1] : vector<8x8xf32> to vector<8xf32>
    %29 = vector.shape_cast %28 : vector<8xf32> to vector<8x1xf32>
    %30 = vector.broadcast %29 : vector<8x1xf32> to vector<8x8xf32>
    %31 = arith.subf %27, %30 : vector<8x8xf32>
    %32 = math.exp %31 : vector<8x8xf32>
    %cst_21 = arith.constant dense<0.000000e+00> : vector<8xf32>
    %33 = vector.multi_reduction <add>, %32, %cst_21 [1] : vector<8x8xf32> to vector<8xf32>
    %34 = vector.shape_cast %33 : vector<8xf32> to vector<8x1xf32>
    %35 = tpu.reciprocal %34 {approx = true} : vector<8x1xf32> -> vector<8x1xf32>
    %36 = vector.broadcast %35 : vector<8x1xf32> to vector<8x8xf32>
    %37 = arith.mulf %32, %36 : vector<8x8xf32>
    %38 = arith.truncf %37 : vector<8x8xf32> to vector<8x8xbf16>
    %cst_22 = arith.constant dense<0.000000e+00> : vector<8x8xf32>
    %39 = tpu.matmul %38, %26, %cst_22 {dimension_numbers = #tpu.dot_dimension_numbers<[1], [0], [0], [1], [0, 0, 1, 1], [], []>} : vector<8x8xbf16>, vector<8x8xbf16>, vector<8x8xf32> -> vector<8x8xf32>
    %40 = vector.extract_strided_slice %10 {offsets = [0, 8], sizes = [8, 8], strides = [1, 1]} : vector<8x32xf32> to vector<8x8xf32>
    %41 = arith.truncf %40 : vector<8x8xf32> to vector<8x8xbf16>
    %42 = vector.extract_strided_slice %15 {offsets = [0, 8], sizes = [8, 8], strides = [1, 1]} : vector<8x32xf32> to vector<8x8xf32>
    %43 = arith.truncf %42 : vector<8x8xf32> to vector<8x8xbf16>
    %44 = vector.extract_strided_slice %20 {offsets = [0, 8], sizes = [8, 8], strides = [1, 1]} : vector<8x32xf32> to vector<8x8xf32>
    %45 = arith.truncf %44 : vector<8x8xf32> to vector<8x8xbf16>
    %cst_23 = arith.constant dense<0.000000e+00> : vector<8x8xf32>
    %46 = tpu.matmul %41, %43, %cst_23 {dimension_numbers = #tpu.dot_dimension_numbers<[1], [1], [0], [0], [0, 0, 1, 0], [], []>} : vector<8x8xbf16>, vector<8x8xbf16>, vector<8x8xf32> -> vector<8x8xf32>
    %cst_24 = arith.constant dense<0xFF800000> : vector<8xf32>
    %47 = vector.multi_reduction <maximumf>, %46, %cst_24 [1] : vector<8x8xf32> to vector<8xf32>
    %48 = vector.shape_cast %47 : vector<8xf32> to vector<8x1xf32>
    %49 = vector.broadcast %48 : vector<8x1xf32> to vector<8x8xf32>
    %50 = arith.subf %46, %49 : vector<8x8xf32>
    %51 = math.exp %50 : vector<8x8xf32>
    %cst_25 = arith.constant dense<0.000000e+00> : vector<8xf32>
    %52 = vector.multi_reduction <add>, %51, %cst_25 [1] : vector<8x8xf32> to vector<8xf32>
    %53 = vector.shape_cast %52 : vector<8xf32> to vector<8x1xf32>
    %54 = tpu.reciprocal %53 {approx = true} : vector<8x1xf32> -> vector<8x1xf32>
    %55 = vector.broadcast %54 : vector<8x1xf32> to vector<8x8xf32>
    %56 = arith.mulf %51, %55 : vector<8x8xf32>
    %57 = arith.truncf %56 : vector<8x8xf32> to vector<8x8xbf16>
    %cst_26 = arith.constant dense<0.000000e+00> : vector<8x8xf32>
    %58 = tpu.matmul %57, %45, %cst_26 {dimension_numbers = #tpu.dot_dimension_numbers<[1], [0], [0], [1], [0, 0, 1, 1], [], []>} : vector<8x8xbf16>, vector<8x8xbf16>, vector<8x8xf32> -> vector<8x8xf32>
    %59 = vector.extract_strided_slice %10 {offsets = [0, 16], sizes = [8, 8], strides = [1, 1]} : vector<8x32xf32> to vector<8x8xf32>
    %60 = arith.truncf %59 : vector<8x8xf32> to vector<8x8xbf16>
    %61 = vector.extract_strided_slice %15 {offsets = [0, 16], sizes = [8, 8], strides = [1, 1]} : vector<8x32xf32> to vector<8x8xf32>
    %62 = arith.truncf %61 : vector<8x8xf32> to vector<8x8xbf16>
    %63 = vector.extract_strided_slice %20 {offsets = [0, 16], sizes = [8, 8], strides = [1, 1]} : vector<8x32xf32> to vector<8x8xf32>
    %64 = arith.truncf %63 : vector<8x8xf32> to vector<8x8xbf16>
    %cst_27 = arith.constant dense<0.000000e+00> : vector<8x8xf32>
    %65 = tpu.matmul %60, %62, %cst_27 {dimension_numbers = #tpu.dot_dimension_numbers<[1], [1], [0], [0], [0, 0, 1, 0], [], []>} : vector<8x8xbf16>, vector<8x8xbf16>, vector<8x8xf32> -> vector<8x8xf32>
    %cst_28 = arith.constant dense<0xFF800000> : vector<8xf32>
    %66 = vector.multi_reduction <maximumf>, %65, %cst_28 [1] : vector<8x8xf32> to vector<8xf32>
    %67 = vector.shape_cast %66 : vector<8xf32> to vector<8x1xf32>
    %68 = vector.broadcast %67 : vector<8x1xf32> to vector<8x8xf32>
    %69 = arith.subf %65, %68 : vector<8x8xf32>
    %70 = math.exp %69 : vector<8x8xf32>
    %cst_29 = arith.constant dense<0.000000e+00> : vector<8xf32>
    %71 = vector.multi_reduction <add>, %70, %cst_29 [1] : vector<8x8xf32> to vector<8xf32>
    %72 = vector.shape_cast %71 : vector<8xf32> to vector<8x1xf32>
    %73 = tpu.reciprocal %72 {approx = true} : vector<8x1xf32> -> vector<8x1xf32>
    %74 = vector.broadcast %73 : vector<8x1xf32> to vector<8x8xf32>
    %75 = arith.mulf %70, %74 : vector<8x8xf32>
    %76 = arith.truncf %75 : vector<8x8xf32> to vector<8x8xbf16>
    %cst_30 = arith.constant dense<0.000000e+00> : vector<8x8xf32>
    %77 = tpu.matmul %76, %64, %cst_30 {dimension_numbers = #tpu.dot_dimension_numbers<[1], [0], [0], [1], [0, 0, 1, 1], [], []>} : vector<8x8xbf16>, vector<8x8xbf16>, vector<8x8xf32> -> vector<8x8xf32>
    %78 = vector.extract_strided_slice %10 {offsets = [0, 24], sizes = [8, 8], strides = [1, 1]} : vector<8x32xf32> to vector<8x8xf32>
    %79 = arith.truncf %78 : vector<8x8xf32> to vector<8x8xbf16>
    %80 = vector.extract_strided_slice %15 {offsets = [0, 24], sizes = [8, 8], strides = [1, 1]} : vector<8x32xf32> to vector<8x8xf32>
    %81 = arith.truncf %80 : vector<8x8xf32> to vector<8x8xbf16>
    %82 = vector.extract_strided_slice %20 {offsets = [0, 24], sizes = [8, 8], strides = [1, 1]} : vector<8x32xf32> to vector<8x8xf32>
    %83 = arith.truncf %82 : vector<8x8xf32> to vector<8x8xbf16>
    %cst_31 = arith.constant dense<0.000000e+00> : vector<8x8xf32>
    %84 = tpu.matmul %79, %81, %cst_31 {dimension_numbers = #tpu.dot_dimension_numbers<[1], [1], [0], [0], [0, 0, 1, 0], [], []>} : vector<8x8xbf16>, vector<8x8xbf16>, vector<8x8xf32> -> vector<8x8xf32>
    %cst_32 = arith.constant dense<0xFF800000> : vector<8xf32>
    %85 = vector.multi_reduction <maximumf>, %84, %cst_32 [1] : vector<8x8xf32> to vector<8xf32>
    %86 = vector.shape_cast %85 : vector<8xf32> to vector<8x1xf32>
    %87 = vector.broadcast %86 : vector<8x1xf32> to vector<8x8xf32>
    %88 = arith.subf %84, %87 : vector<8x8xf32>
    %89 = math.exp %88 : vector<8x8xf32>
    %cst_33 = arith.constant dense<0.000000e+00> : vector<8xf32>
    %90 = vector.multi_reduction <add>, %89, %cst_33 [1] : vector<8x8xf32> to vector<8xf32>
    %91 = vector.shape_cast %90 : vector<8xf32> to vector<8x1xf32>
    %92 = tpu.reciprocal %91 {approx = true} : vector<8x1xf32> -> vector<8x1xf32>
    %93 = vector.broadcast %92 : vector<8x1xf32> to vector<8x8xf32>
    %94 = arith.mulf %89, %93 : vector<8x8xf32>
    %95 = arith.truncf %94 : vector<8x8xf32> to vector<8x8xbf16>
    %cst_34 = arith.constant dense<0.000000e+00> : vector<8x8xf32>
    %96 = tpu.matmul %95, %83, %cst_34 {dimension_numbers = #tpu.dot_dimension_numbers<[1], [0], [0], [1], [0, 0, 1, 1], [], []>} : vector<8x8xbf16>, vector<8x8xbf16>, vector<8x8xf32> -> vector<8x8xf32>
    %97 = tpu.concatenate %39, %58, %77, %96 in 1 : vector<8x8xf32>, vector<8x8xf32>, vector<8x8xf32>, vector<8x8xf32> -> vector<8x32xf32>
    %98 = arith.truncf %97 : vector<8x32xf32> to vector<8x32xbf16>
    %c0_35 = arith.constant 0 : index
    %c0_36 = arith.constant 0 : index
    %99 = vector.load %arg10[%c0_35, %c0_36] : memref<32x32xbf16, #tpu.memory_space<vmem>>, vector<32x32xbf16>
    %cst_37 = arith.constant dense<0.000000e+00> : vector<8x32xf32>
    %100 = tpu.matmul %98, %99, %cst_37 {dimension_numbers = #tpu.dot_dimension_numbers<[1], [0], [0], [1], [0, 0, 1, 1], [], []>} : vector<8x32xbf16>, vector<32x32xbf16>, vector<8x32xf32> -> vector<8x32xf32>
    %c0_38 = arith.constant 0 : index
    %c0_39 = arith.constant 0 : index
    %101 = vector.load %arg11[%c0_38, %c0_39] : memref<1x32xf32, #tpu.memory_space<vmem>>, vector<1x32xf32>
    %102 = vector.broadcast %101 : vector<1x32xf32> to vector<8x32xf32>
    %103 = arith.addf %100, %102 : vector<8x32xf32>
    %c0_40 = arith.constant 0 : index
    %c0_41 = arith.constant 0 : index
    %c0_42 = arith.constant 0 : index
    %104 = vector.load %arg12[%c0_40, %c0_41, %c0_42] : memref<1x8x32xf32, #tpu.memory_space<vmem>>, vector<1x8x32xf32>
    %105 = vector.shape_cast %104 : vector<1x8x32xf32> to vector<8x32xf32>
    %106 = vector.shape_cast %103 : vector<8x32xf32> to vector<1x8x32xf32>
    tpu.vector_store %arg12[%c0_40, %c0_41, %c0_42], %106 {strides = array<i32>} : memref<1x8x32xf32, #tpu.memory_space<vmem>>, vector<1x8x32xf32>,
    return
  }
  func.func @transform_0(%arg0: i32, %arg1: i32) -> (i32, i32, i32) {
    %c0_i32 = arith.constant 0 : i32
    %c0_i32_0 = arith.constant 0 : i32
    return %arg0, %arg1, %c0_i32 : i32, i32, i32
  }
  func.func @transform_1(%arg0: i32, %arg1: i32) -> (i32, i32, i32) {
    %c0_i32 = arith.constant 0 : i32
    %c0_i32_0 = arith.constant 0 : i32
    %c0_i32_1 = arith.constant 0 : i32
    return %arg0, %c0_i32, %c0_i32_0 : i32, i32, i32
  }
  func.func @transform_2(%arg0: i32, %arg1: i32) -> (i32, i32) {
    %c0_i32 = arith.constant 0 : i32
    %c0_i32_0 = arith.constant 0 : i32
    %c0_i32_1 = arith.constant 0 : i32
    return %c0_i32, %c0_i32_0 : i32, i32
  }
  func.func @transform_3(%arg0: i32, %arg1: i32) -> (i32, i32) {
    %c0_i32 = arith.constant 0 : i32
    %c0_i32_0 = arith.constant 0 : i32
    %c0_i32_1 = arith.constant 0 : i32
    return %c0_i32, %c0_i32_0 : i32, i32
  }
  func.func @transform_4(%arg0: i32, %arg1: i32) -> (i32, i32) {
    %c0_i32 = arith.constant 0 : i32
    %c0_i32_0 = arith.constant 0 : i32
    %c0_i32_1 = arith.constant 0 : i32
    return %c0_i32, %c0_i32_0 : i32, i32
  }
  func.func @transform_5(%arg0: i32, %arg1: i32) -> (i32, i32) {
    %c0_i32 = arith.constant 0 : i32
    %c0_i32_0 = arith.constant 0 : i32
    %c0_i32_1 = arith.constant 0 : i32
    return %c0_i32, %c0_i32_0 : i32, i32
  }
  func.func @transform_6(%arg0: i32, %arg1: i32) -> (i32, i32) {
    %c0_i32 = arith.constant 0 : i32
    %c0_i32_0 = arith.constant 0 : i32
    %c0_i32_1 = arith.constant 0 : i32
    return %c0_i32, %c0_i32_0 : i32, i32
  }
  func.func @transform_7(%arg0: i32, %arg1: i32) -> (i32, i32) {
    %c0_i32 = arith.constant 0 : i32
    %c0_i32_0 = arith.constant 0 : i32
    %c0_i32_1 = arith.constant 0 : i32
    return %c0_i32, %c0_i32_0 : i32, i32
  }
  func.func @transform_8(%arg0: i32, %arg1: i32) -> (i32, i32) {
    %c0_i32 = arith.constant 0 : i32
    %c0_i32_0 = arith.constant 0 : i32
    %c0_i32_1 = arith.constant 0 : i32
    return %c0_i32, %c0_i32_0 : i32, i32
  }
  func.func @transform_9(%arg0: i32, %arg1: i32) -> (i32, i32) {
    %c0_i32 = arith.constant 0 : i32
    %c0_i32_0 = arith.constant 0 : i32
    %c0_i32_1 = arith.constant 0 : i32
    return %c0_i32, %c0_i32_0 : i32, i32
  }
  func.func @transform_10(%arg0: i32, %arg1: i32) -> (i32, i32, i32) {
    %c0_i32 = arith.constant 0 : i32
    %c0_i32_0 = arith.constant 0 : i32
    return %arg0, %arg1, %c0_i32 : i32, i32, i32
  }
}

</mosaic_0001>

<bundles_post_ra>
// kernel: tpu_custom_call.1
= control target key start
LH: loop header
LB: loop body
LE: loop exit
PB: predicated region body
PF: predicated region fallthrough
CT: control target
= control target key end

     0   :  { %s2225_s0 = inlined_call_operand.hbm [shape: f32[2,8,16], index: 0, kind: input, shape index: {}]   ;;  %s2226_s1 = inlined_call_operand.hbm [shape: f32[2,8,16], index: 1, kind: input, shape index: {}]   ;;  %s2227_s2 = inlined_call_operand.hbm [shape: bf16[16,32], index: 2, kind: input, shape index: {}]   ;;  %s2228_s3 = inlined_call_operand.vmem [shape: f32[1,32], index: 3, kind: input, shape index: {}]   ;;  %s2229_s4 = inlined_call_operand.vmem [shape: bf16[16,32], index: 4, kind: input, shape index: {}]   ;;  %s2230_s5 = inlined_call_operand.vmem [shape: f32[1,32], index: 5, kind: input, shape index: {}]   ;;  %s2231_s6 = inlined_call_operand.hbm [shape: bf16[16,32], index: 6, kind: input, shape index: {}]   ;;  %s2232_s7 = inlined_call_operand.vmem [shape: f32[1,32], index: 7, kind: input, shape index: {}]   ;;  %s2233_s8 = inlined_call_operand.vmem [shape: bf16[32,32], index: 8, kind: input, shape index: {}]   ;;  %s2234_s9 = inlined_call_operand.vmem [shape: f32[1,32], index: 9, kind: input, shape index: {}]   ;;  %s2235_s10 = inlined_call_operand.hbm [shape: f32[2,8,32], index: 10, kind: output, shape index: {}]  }
   0x1   :  { %2245 = sst [smem:[#allocation21_spill]] %s2227_s2 }
   0x2   :  { %2246 = sst [smem:[#allocation22_spill]] %s2231_s6 }
   0x3   :  { %2247 = sst [smem:[#allocation23_spill]] %s2234_s9 }
   0x4   :  { %2248 = sst [smem:[#allocation24_spill]] %s2235_s10 }
   0x5   :  { %15 = vsyncpa [#allocation3], 0 }
   0x6   :  { %17 = vsyncpa [#allocation3 + $0x1], 0 }
   0x7   :  { %18 = vsyncpa [#allocation6], 0 }
   0x8   :  { %20 = vsyncpa [#allocation6 + $0x1], 0 }
   0x9   :  { %21 = vsyncpa [#allocation9], 0 }
   0xa   :  { %22 = vsyncpa [#allocation4], 0 }
   0xb   :  { %24 = vsyncpa [#allocation4 + $0x1], 0  ;;  %s1840_s13 = smov 0   ;;  %s1842_s14 = smov 0  }
   0xc   :  { %s1844_s15 = smov 0   ;;  %s1846_s16 = smov 0  }
   0xd   :  { %s1848_s17 = smov 0   ;;  %s1850_s18 = smov 0  }
   0xe LB: > { %2249 = sst [smem:[#allocation16_spill]] %s1748_s13  ;;  %s1871_s19 = sadd.s32 4294967295, %s1768_s18   ;;  %s1768_s18 = sphi %s1850_s18, %s30_s18   ;;  %s1764_s17 = sphi %s1848_s17, %s2278_s17   ;;  %s1760_s16 = sphi %s1846_s16, %s2277_s16   ;;  %s1756_s15 = sphi %s1844_s15, %s2281_s15   ;;  %s1752_s14 = sphi %s1842_s14, %s2280_s14   ;;  %s1748_s13 = sphi %s1840_s13, %s2279_s13  }
   0xf   : > { %2250 = sst [smem:[#allocation17_spill]] %s1764_s17  ;;  %s1300_s20 = sadd.s32 4294967294, %s1768_s18  }
  0x10   : > { %p64_p0 = scmp.ne.s32.totalorder %s1752_s14, %s1748_s13  ;;  %p2237_p1 = scmp.eq.s32.totalorder %s1871_s19, 0 }
  0x11   : > { %p290_p3 = scmp.eq.s32.totalorder %s1300_s20, 1  ;;  %p1301_p5 = scmp.ge.s32.totalorder %s1768_s18, 1 }
  0x12   : > { %p1880_p4 = por %p2237_p1, %p64_p0  ;;  %p297_p7 = scmp.lt.s32.totalorder %s1768_s18, 3 }
  0x13   : > { %p1885_p6 = por %p290_p3, %p64_p0  ;;  %s1770_s24 = smov [#allocation7]  }
  0x14   : > { %s2251_s21 = scalar_select %p1880_p4, 1, 0 }
  0x15   : > { %s2252_s22 = scalar_select %p1885_p6, 1, 0 }
  0x16   : > { %p1890_p8 = pnand %p1301_p5, %p297_p7  ;;  %s309_s25 = sshll.u32 %s1770_s24, 4  ;;  %s1894_s25 = int_to_ptr.vmem [resolvable:$true] %s309_s25 }
  0x17   : > { %2253 = sst [smem:[#allocation18_spill]] %s2252_s22  ;;  %s1771_s27 = smov [#allocation8]  }
  0x18   : > { %s2254_s23 = scalar_select %p1890_p8, 1, 0 }
  0x19   : > { %p1453_p9 = pneg %p1890_p8  ;;  %s331_s28 = sshll.u32 %s1771_s27, 4  ;;  %s1905_s28 = int_to_ptr.vmem [resolvable:$true] %s331_s28 }
  0x1a   : > { %s2256_s2 = sld [smem:[#allocation21_spill]] }
  0x1b   : > { %p1901_p11 = pnand %p1453_p9, %p2237_p1 }
  0x1d   : > { %p1560_p13 = pneg %p1901_p11 }
  0x20   : > { %s1558_s11 = scalar_lea.hbm %s2256_s2, 128 }
  0x21   : > { %p1559_p12 = scmp.ne.s32.totalorder %s2256_s2, %s1558_s11  ;;  %p1565_p5 = scmp.lt.u32.totalorder %s1558_s11, %s2256_s2 }
  0x23   : > { %p1561_p0 = pnand %p1560_p13, %p1559_p12 }
  0x25   : > { %p1562_p3 = pneg %p1561_p0 }
  0x27   : > { %p1567_p7 = pnand %p1565_p5, %p1562_p3 }
  0x29   : > { %1570 = shalt.err (!%p1567_p7)
}
  0x2a   : > { %s1571_s27 = scalar_lea.vmem %s1894_s25, 128  ;;  %p1579_p2 = scmp.lt.s32.totalorder %s1894_s25, %s1894_s25 }
  0x2b   : > { %p1572_p9 = scmp.ne.s32.totalorder %s1894_s25, %s1571_s27  ;;  %p1580_p12 = scmp.lt.s32.totalorder %s1571_s27, %s1571_s27 }
  0x2d   : > { %p1574_p10 = pnand %p1572_p9, %p1560_p13  ;;  %p1581_p0 = por %p1580_p12, %p1579_p2 }
  0x2f   : > { %p1575_p1 = pneg %p1574_p10 }
  0x31   : > { %p1582_p6 = pnand %p1581_p0, %p1575_p1 }
  0x33   : > { %1585 = shalt.err (!%p1582_p6)
}
  0x34   : > { %s1772_s22 = smov 64   ;;  %s1773_s29 = smov 4  }
  0x35   : > { %1456 = dma.hbm_to_vmem [thread:$0]  (!%p1901_p11), %s2256_s2, 128, %s1894_s25, [#allocation6], %s1772_s22, %s1772_s22, %s1773_s29  }
  0x36   : > { %s2257_s6 = sld [smem:[#allocation22_spill]] }
  0x3c   : > { %s1586_s24 = scalar_lea.hbm %s2257_s6, 128 }
  0x3d   : > { %p1587_p2 = scmp.ne.s32.totalorder %s2257_s6, %s1586_s24  ;;  %p1593_p10 = scmp.lt.u32.totalorder %s1586_s24, %s2257_s6 }
  0x3f   : > { %p1589_p1 = pnand %p1587_p2, %p1560_p13 }
  0x41   : > { %p1590_p6 = pneg %p1589_p1 }
  0x43   : > { %p1595_p3 = pnand %p1593_p10, %p1590_p6 }
  0x45   : > { %1598 = shalt.err (!%p1595_p3)
}
  0x46   : > { %s1599_s25 = scalar_lea.vmem %s1905_s28, 128  ;;  %p1607_p12 = scmp.lt.s32.totalorder %s1905_s28, %s1905_s28 }
  0x47   : > { %p1600_p5 = scmp.ne.s32.totalorder %s1905_s28, %s1599_s25  ;;  %p1608_p0 = scmp.lt.s32.totalorder %s1599_s25, %s1599_s25 }
  0x49   : > { %p1602_p7 = pnand %p1600_p5, %p1560_p13  ;;  %p1609_p2 = por %p1608_p0, %p1607_p12 }
  0x4b   : > { %p1603_p9 = pneg %p1602_p7 }
  0x4d   : > { %p1610_p1 = pnand %p1609_p2, %p1603_p9 }
  0x4f   : > { %1613 = shalt.err (!%p1610_p1)
}
  0x50   : > { %1459 = dma.hbm_to_vmem [thread:$0]  (!%p1901_p11), %s2257_s6, 128, %s1905_s28, [#allocation9], %s1772_s22, %s1772_s22, %s1773_s29  }
  0x51   : > { %s42_s13 = sadd.s32 1, %s1764_s17  ;;  %s51_s30 = sadd.s32 1, %s1756_s15 }
  0x52   : > { %p44_p13 = scmp.ge.s32.totalorder %s42_s13, 2  ;;  %p58_p6 = scmp.ne.s32.totalorder %s1756_s15, %s1752_s14 }
  0x53   : > { %p59_p10 = scmp.eq.s32.totalorder %s1768_s18, 0  ;;  %p1473_p3 = scmp.lt.s32.totalorder %s1768_s18, 2 }
  0x54   : > { %s2283_s13 = smov (%p44_p13, %s42_s13), 0  ;;  %p2259_p7 = scmp.eq.s32.totalorder %s1871_s19, 1 }
  0x55   : > { %2258 = sst [smem:[#allocation19_spill]] %s2283_s13  ;;  %p60_p5 = por %p59_p10, %p58_p6 }
  0x56   : > { %p1969_p9 = por %p2259_p7, %p58_p6  ;;  %s46_s11 = ssub.s32 %s1764_s17, %s2283_s13 }
  0x57   : > { %s354_s12 = sand.u32 1, %s1756_s15   ;;  %p49_p12 = scmp.eq.s32.totalorder %s46_s11, 0 }
  0x58   : > { %s2260_s26 = scalar_select %p1969_p9, 1, 0 }
  0x59   : > { %s1976_s28 = sshll.u32 %s354_s12, 3  ;;  %s1306_s22 = sshll.u32 %s1764_s17, 7 }
  0x5a   : > { %s1980_s29 = scalar_select %p49_p12, %s1756_s15, %s51_s30  }
  0x5b   : > { %s1985_s27 = scalar_lea.hbm %s2225_s0, %s1306_s22  ;;  %s358_s25 = scalar_lea.vmem [#allocation2], %s1976_s28 }
  0x5c   : > { %2261 = sst [smem:[#allocation20_spill]] %s1980_s29  ;;  %s366_s9 = sshll.u32 %s358_s25, 4  ;;  %s1994_s9 = int_to_ptr.vmem [resolvable:$true] %s366_s9 }
  0x5d   : > { %p1990_p11 = pnand %p1473_p3, %p60_p5  ;;  %s1999_s20 = scalar_lea.hbm %s2226_s1, %s1306_s22 }
  0x5e   : > { %s355_s24 = scalar_lea.sflag [#allocation3], %s354_s12  ;;  %s1614_s2 = scalar_lea.hbm %s1985_s27, 128 }
  0x5f   : > { %p1615_p0 = scmp.ne.s32.totalorder %s1985_s27, %s1614_s2  ;;  %p1616_p2 = pneg %p1990_p11 }
  0x60   : > { %s1619_s13 = scalar_lea.hbm %s2225_s0, 256  ;;  %p1620_p6 = scmp.lt.u32.totalorder %s1985_s27, %s2225_s0 }
  0x61   : > { %p1617_p1 = pnand %p1616_p2, %p1615_p0  ;;  %p1621_p10 = scmp.lt.u32.totalorder %s1619_s13, %s1614_s2 }
  0x62   : > { %p1623_p5 = scmp.lt.u32.totalorder %s1614_s2, %s1985_s27 }
  0x63   : > { %p1618_p13 = pneg %p1617_p1  ;;  %p1622_p3 = por %p1621_p10, %p1620_p6 }
  0x65   : > { %p1624_p7 = por %p1623_p5, %p1622_p3 }
  0x67   : > { %p1625_p12 = pnand %p1624_p7, %p1618_p13 }
  0x69   : > { %1628 = shalt.err (!%p1625_p12)
}
  0x6a   : > { %s1629_s12 = scalar_lea.vmem %s1994_s9, 128  ;;  %s1774_s6 = smov [#allocation2]  }
  0x6b   : > { %p1630_p0 = scmp.ne.s32.totalorder %s1994_s9, %s1629_s12  ;;  %s1634_s22 = sshll.u32 %s1774_s6, 4  ;;  %s1635_s22 = int_to_ptr.vmem [resolvable:$false] %s1634_s22 }
  0x6c   : > { %s1636_s17 = scalar_lea.vmem %s1635_s22, 256  ;;  %p1637_p4 = scmp.lt.s32.totalorder %s1994_s9, %s1635_s22 }
  0x6d   : > { %p1632_p1 = pnand %p1630_p0, %p1616_p2  ;;  %p1638_p6 = scmp.lt.s32.totalorder %s1636_s17, %s1629_s12 }
  0x6f   : > { %p1633_p9 = pneg %p1632_p1  ;;  %p1639_p10 = por %p1638_p6, %p1637_p4 }
  0x71   : > { %p1640_p3 = pnand %p1639_p10, %p1633_p9 }
  0x73   : > { %1643 = shalt.err (!%p1640_p3)
}
  0x74   : > { %1463 = dma.hbm_to_vmem [thread:$0]  (!%p1990_p11), %s1985_s27, 128, %s1994_s9, %s355_s24  }
  0x75   : > { %s373_s2 = sand.u32 1, %s1768_s18   ;;  %s377_s13 = scalar_lea.vmem [#allocation5], %s1976_s28 }
  0x76   : > { %s384_s29 = sshll.u32 %s377_s13, 4  ;;  %s374_s30 = scalar_lea.sflag [#allocation6], %s373_s2  ;;  %s385_s29 = int_to_ptr.vmem [resolvable:$true] %s384_s29 }
  0x77   : > { %s1644_s11 = scalar_lea.hbm %s1999_s20, 128  ;;  %s1649_s6 = scalar_lea.hbm %s2226_s1, 256 }
  0x78   : > { %p1645_p4 = scmp.ne.s32.totalorder %s1999_s20, %s1644_s11  ;;  %p1650_p5 = scmp.lt.u32.totalorder %s1999_s20, %s2226_s1 }
  0x79   : > { %p1651_p7 = scmp.lt.u32.totalorder %s1649_s6, %s1644_s11  ;;  %p1653_p0 = scmp.lt.u32.totalorder %s1644_s11, %s1999_s20 }
  0x7a   : > { %p1647_p9 = pnand %p1645_p4, %p1616_p2 }
  0x7b   : > { %p1652_p12 = por %p1651_p7, %p1650_p5 }
  0x7c   : > { %p1648_p13 = pneg %p1647_p9 }
  0x7d   : > { %p1654_p1 = por %p1653_p0, %p1652_p12 }
  0x7f   : > { %p1655_p6 = pnand %p1654_p1, %p1648_p13 }
  0x81   : > { %1658 = shalt.err (!%p1655_p6)
}
  0x82   : > { %s1659_s28 = scalar_lea.vmem %s385_s29, 128  ;;  %s1775_s27 = smov [#allocation5]  }
  0x83   : > { %p1660_p10 = scmp.ne.s32.totalorder %s385_s29, %s1659_s28  ;;  %s1664_s9 = sshll.u32 %s1775_s27, 4  ;;  %s1665_s9 = int_to_ptr.vmem [resolvable:$false] %s1664_s9 }
  0x84   : > { %s1666_s24 = scalar_lea.vmem %s1665_s9, 256  ;;  %p1667_p9 = scmp.lt.s32.totalorder %s385_s29, %s1665_s9 }
  0x85   : > { %p1662_p3 = pnand %p1660_p10, %p1616_p2  ;;  %p1668_p8 = scmp.lt.s32.totalorder %s1666_s24, %s1659_s28 }
  0x87   : > { %p1663_p4 = pneg %p1662_p3  ;;  %p1669_p5 = por %p1668_p8, %p1667_p9 }
  0x89   : > { %p1670_p7 = pnand %p1669_p5, %p1663_p4 }
  0x8b   : > { %1673 = shalt.err (!%p1670_p7)
}
  0x8c   : > { %1466 = dma.hbm_to_vmem [thread:$0]  (!%p1990_p11), %s1999_s20, 128, %s385_s29, %s374_s30  }
  0x8d   : > { %p2263_p13 = scmp.ne.s32.totalorder %s2254_s23, 0 }
  0x8e   : > { %s2050_s2 = sand.u32 (!%p2263_p13), 1, %s1752_s14   ;;  %p2264_p8 = scmp.ne.s32.totalorder (!%p2263_p13), %s2251_s21, 0 }
  0x8f   : > { %393 = sbr.rel (%p2263_p13) target bundleno = 1609 (0x649), region = 60  ;;  %s2053_s13 = sshll.u32 (!%p2263_p13), %s2050_s2, 3 }
  0x90   : > { %s396_s11 = scalar_lea.sflag (!%p2263_p13), [#allocation3], %s2050_s2  ;;  %s399_s25 = scalar_lea.vmem (!%p2263_p13), [#allocation2], %s2053_s13 }
  0x96   : > { %1727 = dma.done.wait (%p2264_p8), %s396_s11, 128  }
  0x97   : > { %1729 = vsyncadd (%p2264_p8), %s396_s11, 4294967168  ;;  %s404_s23 = sand.u32 1, %s1871_s19   ;;  %s408_s20 = scalar_lea.vmem [#allocation5], %s2053_s13 }
  0x98   : > { %s405_s10 = scalar_lea.sflag [#allocation6], %s404_s23 }
  0x99   : > { %1731 = dma.done.wait (%p2264_p8), %s405_s10, 128  }
  0x9a   : > { %1733 = vsyncadd (%p2264_p8), %s405_s10, 4294967168  ;;  %p2265_p11 = scmp.eq.s32.totalorder %s1871_s19, 0 }
  0x9c   : > { %1735 = dma.done.wait (%p2265_p11), [#allocation6], 128   ;;  %p2266_p2 = pmov %p2265_p11 }
  0x9e   : > { %1737 = vsyncadd (%p2266_p2), [#allocation6], 4294967168  ;;  %p2267_p12 = pmov %p2266_p2 }
  0x9f   : > { %p2268_p0 = pmov %p2266_p2 }
  0xa0   : > { %1739 = dma.done.wait (%p2267_p12), [#allocation9], 128  }
  0xa1   : > { %1741 = vsyncadd (%p2268_p0), [#allocation9], 4294967168  ;;  %v1776_v0 = vmov 0.0   ;;  %vm1777_vm0 = vmmov 0   ;;  %v1537_v1 = vld [vmem:[%s2229_s4] sm:$0xff]   ;;  %v461_v2 = vld [vmem:[%s408_s20] sm:$0xff] }
  0xa2   : > { %1371 = vmatprep.subr.bf16.mxu1 %v1776_v0  ;;  %1373 = vmatprep.mubr.msk.bf16.mxu1 %vm1777_vm0, %v1776_v0  ;;  %v462_v3 = vpack.c.bf16 %v461_v2, %v461_v2  ;;  %vm478_vm1 = vcmask 130048   ;;  %v1538_v4 = vld [vmem:[#allocation7] sm:$0xff]   ;;  %vm638_vm2 = vcmask 64512   ;;  %s1778_s22 = smov 112   ;;  %s1779_s17 = smov 120   ;;  %v1539_v22 = vld [vmem:[#allocation8] sm:$0xff]  }
  0xa3   : > { %1365 = vmatprep.subr.bf16.mxu0 %v1776_v0  ;;  %1367 = vmatprep.mubr.msk.bf16.mxu0 %vm1777_vm0, %v1776_v0  ;;  %v459_v5 = vld [vmem:[%s399_s25] sm:$0xff]  ;;  %s1780_s28 = smov 104   ;;  %vm700_vm3 = vcmask 1043456   ;;  %s1781_s25 = smov 8   ;;  %vm1091_vm4 = vcmask 195584   ;;  %vm1117_vm5 = vcmask 261120  }
  0xa4   : > { %1372 = vmatpush3.bf16.msra.mxu1 %v1537_v1  ;;  %v460_v6 = vpack.c.bf16 %v459_v5, %v459_v5  ;;  %1366 = vmatpush3.bf16.msra.mxu0 %v1538_v4  ;;  %v1318_v7 = vld [vmem:[%s2230_s5] ss:$0 sm:$0xff]  ;;  %s1782_s20 = smov 16   ;;  %s1783_s21 = smov 24  }
  0xa5   : > { %1383 = vmatprep.subr.bf16.mxu1 %v1776_v0  ;;  %1377 = vmatprep.subr.bf16.mxu0 %v1776_v0  ;;  %v1315_v9 = vld [vmem:[%s2228_s3] ss:$0 sm:$0xff]  ;;  %s2269_s30 = sld [smem:[#allocation23_spill]]  ;;  %s1337_s12 = sshll.u32 %s1760_s16, 7 }
  0xa6   : > { %v1321_v37 = vld [vmem:[%s2232_s7] ss:$0 sm:$0xff]  ;;  %s457_s6 = scalar_lea.vmem [#allocation10], %s2053_s13  ;;  %s2270_s27 = sld [smem:[#allocation24_spill]] }
  0xa7   : > { %1374 = vmatmul.mubr.msk.bf16.vlgmr.msra.gmra.mrb[0].mxu1 %vm478_vm1, %v462_v3  ;;  %1368 = vmatmul.mubr.msk.bf16.vlgmr.msra.gmra.mrb[0].mxu0 %vm478_vm1, %v460_v6  ;;  %s1163_s24 = scalar_lea.sflag [#allocation4], %s2050_s2  ;;  %p2271_p6 = scmp.ne.s32.totalorder %s2260_s26, 0 }
  0xa8   : > { %1385 = vmatprep.mubr.msk.bf16.mxu1 %vm1777_vm0, %v1776_v0  ;;  %1379 = vmatprep.mubr.msk.bf16.mxu0 %vm1777_vm0, %v1776_v0  ;;  %s1784_s13 = smov [#allocation10]  }
  0xa9   : > { %1378 = vmatpush3.bf16.msra.mxu0 %v1539_v22  ;;  %s1678_s11 = sshll.u32 %s1784_s13, 4  ;;  %s1679_s11 = int_to_ptr.vmem [resolvable:$false] %s1678_s11 }
  0xaa   : > { %1389 = vmatprep.subr.bf16.mxu0 %v1776_v0 }
  0xac   : > { %s2176_s9 = scalar_lea.hbm %s2270_s27, %s1337_s12 }
  0xaf   : > { %1380 = vmatmul.mubr.msk.bf16.vlgmr.msra.gmra.mrb[4].mxu0 %vm478_vm1, %v462_v3 }
  0xb0   : > { %1391 = vmatprep.mubr.msk.bf16.mxu0 %vm1777_vm0, %v1776_v0 }
 0x17a   : > { %v574_v8 = vpop.f32.mrb[0].mxu1  ;;  %v516_v13 = vpop.f32.mrb[0].mxu0 }
 0x17b   : > { %v575_v10 = vadd.f32 %v1318_v7, %v574_v8  ;;  %v1375_v11 = vpop.f32.mrb[1].mxu1  ;;  %v517_v16 = vadd.f32 %v1315_v9, %v516_v13  ;;  %v1369_v17 = vpop.f32.mrb[1].mxu0 }
 0x17c   : > { %v577_v12 = vpop.f32.mrb[2].mxu1  ;;  %v519_v18 = vpop.f32.mrb[2].mxu0 }
 0x17d   : > { %v636_v14 = vpack.c.bf16 %v575_v10, %v575_v10  ;;  %v1376_v15 = vpop.f32.mrb[3].mxu1  ;;  %v635_v19 = vpack.c.bf16 %v517_v16, %v517_v16  ;;  %v1370_v21 = vpop.f32.mrb[3].mxu0 }
 0x17f   : > { %859 = vrot.lane.b32.xlu1 %v636_v14, %s1778_s22  ;;  %748 = vrot.lane.b32.xlu0 %v636_v14, %s1779_s17  ;;  %v643_v20 = vsel %vm638_vm2, %v636_v14, 0 }
 0x180   : > { %1384 = vmatpush3.bf16.xpose.msra.mxu1 %v643_v20 }
 0x181   : > { %1395 = vmatprep.subr.bf16.mxu1 %v1776_v0 }
 0x182   : > { %v629_v38 = vpop.f32.mrb[4].mxu0 }
 0x183   : > { %857 = vrot.lane.b32.xlu1 %v635_v19, %s1778_s22  ;;  %745 = vrot.lane.b32.xlu0 %v635_v19, %s1779_s17  ;;  %v630_v39 = vadd.f32 %v1321_v37, %v629_v38  ;;  %v1381_v40 = vpop.f32.mrb[5].mxu0 }
 0x184   : > { %v632_v41 = vpop.f32.mrb[6].mxu0 }
 0x185   : > { %v637_v42 = vpack.c.bf16 %v630_v39, %v630_v39  ;;  %v1382_v43 = vpop.f32.mrb[7].mxu0 }
 0x186   : > { %v1540_v43 = vld [vmem:[%s2233_s8] sm:$0xff]  }
 0x187   : > { %967 = vrot.lane.b32.xlu1 %v635_v19, %s1780_s28  ;;  %969 = vrot.lane.b32.xlu0 %v636_v14, %s1780_s28  ;;  %v702_v44 = vsel %vm700_vm3, %v637_v42, 0 }
 0x188   : > { %1386 = vmatmul.mubr.msk.bf16.vlgmr.msra.gmra.mrb[4].mxu1 %vm638_vm2, %v635_v19  ;;  %1390 = vmatpush3.bf16.msra.mxu0 %v702_v44 }
 0x189   : > { %1397 = vmatprep.mubr.msk.bf16.mxu1 %vm1777_vm0, %v1776_v0  ;;  %1401 = vmatprep.subr.bf16.mxu0 %v1776_v0 }
 0x1f1   : > { %v749_v23 = vpop.permute.xlu0 %748  ;;  %v860_v25 = vpop.permute.xlu1 %859 }
 0x1f2   : > { %v754_v24 = vsel %vm638_vm2, %v749_v23, 0  ;;  %v865_v27 = vsel %vm638_vm2, %v860_v25, 0 }
 0x1f3   : > { %1396 = vmatpush3.bf16.xpose.msra.mxu1 %v754_v24 }
 0x1f4   : > { %1407 = vmatprep.subr.bf16.mxu1 %v1776_v0 }
 0x1f5   : > { %v746_v26 = vpop.permute.xlu0 %745  ;;  %v858_v29 = vpop.permute.xlu1 %857 }
 0x1f9   : > { %v970_v28 = vpop.permute.xlu0 %969  ;;  %v968_v31 = vpop.permute.xlu1 %967 }
 0x1fa   : > { %1398 = vmatmul.mubr.msk.bf16.vlgmr.msra.gmra.mrb[8].mxu1 %vm638_vm2, %v746_v26  ;;  %v975_v30 = vsel %vm638_vm2, %v970_v28, 0 }
 0x1fb   : > { %1408 = vmatpush3.bf16.xpose.msra.mxu1 %v865_v27  ;;  %1409 = vmatprep.mubr.msk.bf16.mxu1 %vm1777_vm0, %v1776_v0 }
 0x1fc   : > { %1419 = vmatprep.subr.bf16.mxu1 %v1776_v0 }
 0x202   : > { %1410 = vmatmul.mubr.msk.bf16.vlgmr.msra.gmra.mrb[12].mxu1 %vm638_vm2, %v858_v29 }
 0x203   : > { %1420 = vmatpush3.bf16.xpose.msra.mxu1 %v975_v30  ;;  %1421 = vmatprep.mubr.msk.bf16.mxu1 %vm1777_vm0, %v1776_v0 }
 0x204   : > { %1431 = vmatprep.subr.bf16.mxu1 %v1776_v0 }
 0x20a   : > { %1422 = vmatmul.mubr.msk.bf16.vlgmr.msra.gmra.mrb[16].mxu1 %vm638_vm2, %v968_v31 }
 0x20b   : > { %1435 = vmatprep.mubr.msk.bf16.mxu1 %vm1777_vm0, %v1776_v0  ;;  %1432 = vmatpush3.bf16.msra.mxu1 %v1540_v43 }
 0x20c   : > { %1433 = vmatprep.subr.bf16.mxu1 %v1776_v0 }
 0x25b   : > { %v679_v32 = vpop.f32.mrb[4].mxu1 }
 0x25c   : > { %v1387_v33 = vpop.f32.mrb[5].mxu1  ;;  %v685_v34 = vsel %vm638_vm2, %v679_v32, -inf }
 0x25d   : > { %686 = vmax.xlane.f32.xlu0 %v685_v34  ;;  %v682_v35 = vpop.f32.mrb[6].mxu1 }
 0x25e   : > { %v1388_v36 = vpop.f32.mrb[7].mxu1 }
 0x2cd   : > { %v790_v45 = vpop.f32.mrb[8].mxu1 }
 0x2ce   : > { %v1399_v46 = vpop.f32.mrb[9].mxu1  ;;  %v796_v47 = vsel %vm638_vm2, %v790_v45, -inf }
 0x2cf   : > { %797 = vmax.xlane.f32.xlu1 %v796_v47  ;;  %v793_v48 = vpop.f32.mrb[10].mxu1 }
 0x2d0   : > { %v1400_v49 = vpop.f32.mrb[11].mxu1  ;;  %v1541_v48 = vld [vmem:[%s2233_s8 + $0x8] sm:$0xff]  }
 0x2d1   : > { %1434 = vmatpush3.bf16.msra.mxu1 %v1541_v48 }
 0x2d5   : > { %v901_v50 = vpop.f32.mrb[12].mxu1 }
 0x2d6   : > { %v1411_v51 = vpop.f32.mrb[13].mxu1  ;;  %v907_v52 = vsel %vm638_vm2, %v901_v50, -inf }
 0x2d7   : > { %908 = vmax.xlane.f32.xlu0 %v907_v52  ;;  %v904_v53 = vpop.f32.mrb[14].mxu1 }
 0x2d8   : > { %v1412_v54 = vpop.f32.mrb[15].mxu1 }
 0x2dd   : > { %v1011_v55 = vpop.f32.mrb[16].mxu1 }
 0x2de   : > { %v1423_v56 = vpop.f32.mrb[17].mxu1  ;;  %v1017_v57 = vsel %vm638_vm2, %v1011_v55, -inf }
 0x2df   : > { %1018 = vmax.xlane.f32.xlu0 %v1017_v57  ;;  %v1014_v58 = vpop.f32.mrb[18].mxu1 }
 0x2e0   : > { %v1424_v59 = vpop.f32.mrb[19].mxu1 }
 0x2ea   : > { %v687_v60 = vpop.xlane.xlu0 %686 }
 0x2eb   : > { %v688_v61 = vsub.f32 %v679_v32, %v687_v60 }
 0x2ed   : > { %v689_v62 = vmul.f32 1.442695, %v688_v61 }
 0x2ef   : > { %1542 = vpow2.f32 %v689_v62 }
 0x2f9   : > { %v1543_v63 = vpop.eup %1542 }
 0x2fa   : > { %v691_v1 = vsel %vm638_vm2, %v1543_v63, 0.0 }
 0x2fb   : > { %692 = vadd.xlane.f32.xlu1 %v691_v1 }
 0x30c   : > { %809 = vrot.lane.b32.xlu1 %v637_v42, %s1779_s17 }
 0x35c   : > { %v798_v2 = vpop.xlane.xlu1 %797 }
 0x35d   : > { %v799_v3 = vsub.f32 %v790_v45, %v798_v2 }
 0x35f   : > { %v800_v4 = vmul.f32 1.442695, %v799_v3 }
 0x361   : > { %1544 = vpow2.f32 %v800_v4 }
 0x364   : > { %v909_v5 = vpop.xlane.xlu0 %908 }
 0x365   : > { %v910_v6 = vsub.f32 %v901_v50, %v909_v5 }
 0x367   : > { %v911_v7 = vmul.f32 1.442695, %v910_v6 }
 0x369   : > { %1546 = vpow2.f32 %v911_v7 }
 0x36b   : > { %v1545_v8 = vpop.eup %1544 }
 0x36c   : > { %v1019_v9 = vpop.xlane.xlu0 %1018  ;;  %v802_v10 = vsel %vm638_vm2, %v1545_v8, 0.0 }
 0x36d   : > { %v1020_v11 = vsub.f32 %v1011_v55, %v1019_v9  ;;  %803 = vadd.xlane.f32.xlu0 %v802_v10 }
 0x36f   : > { %v1021_v12 = vmul.f32 1.442695, %v1020_v11 }
 0x371   : > { %1548 = vpow2.f32 %v1021_v12 }
 0x373   : > { %v1547_v13 = vpop.eup %1546 }
 0x374   : > { %v913_v14 = vsel %vm638_vm2, %v1547_v13, 0.0 }
 0x375   : > { %914 = vadd.xlane.f32.xlu1 %v913_v14 }
 0x37b   : > { %v1549_v15 = vpop.eup %1548 }
 0x37c   : > { %v1023_v16 = vsel %vm638_vm2, %v1549_v15, 0.0 }
 0x37d   : > { %1024 = vadd.xlane.f32.xlu0 %v1023_v16 }
 0x386   : > { %1029 = vrot.lane.b32.xlu1 %v637_v42, %s1780_s28 }
 0x388   : > { %v693_v17 = vpop.xlane.xlu1 %692 }
 0x389   : > { %1550 = vrcp.f32 %v693_v17 }
 0x38c   : > { %v810_v19 = vpop.permute.xlu1 %809 }
 0x38d   : > { %v815_v22 = vsel %vm700_vm3, %v810_v19, 0 }
 0x393   : > { %v1551_v18 = vpop.eup %1550  ;;  %919 = vrot.lane.b32.xlu0 %v637_v42, %s1778_s22  ;;  %s1177_s22 = sshll.u32 %s457_s6, 4  ;;  %s2178_s22 = int_to_ptr.vmem [resolvable:$true] %s1177_s22 }
 0x394   : > { %v695_v20 = vmul.f32 %v1551_v18, %v1543_v63  ;;  %v1332_v63 = vld [vmem:[%s2269_s30] ss:$0 sm:$0xff]  ;;  %s1674_s16 = scalar_lea.vmem %s2178_s22, 128  ;;  %p1681_p4 = scmp.lt.s32.totalorder %s2178_s22, %s1679_s11 }
 0x395   : > { %p1675_p1 = scmp.ne.s32.totalorder %s2178_s22, %s1674_s16 }
 0x396   : > { %v696_v21 = vpack.c.bf16 %v695_v20, %v695_v20 }
 0x397   : > { %p1676_p10 = pnand %p1675_p1, %p2271_p6 }
 0x398   : > { %1392 = vmatmul.mubr.msk.bf16.vlgmr.msra.gmra.mrb[8].mxu0 %vm638_vm2, %v696_v21 }
 0x399   : > { %1402 = vmatpush3.bf16.msra.mxu0 %v815_v22  ;;  %1403 = vmatprep.mubr.msk.bf16.mxu0 %vm1777_vm0, %v1776_v0  ;;  %p1677_p3 = pneg %p1676_p10 }
 0x39a   : > { %1413 = vmatprep.subr.bf16.mxu0 %v1776_v0 }
 0x3fa   : > { %v804_v23 = vpop.xlane.xlu0 %803 }
 0x3fb   : > { %1552 = vrcp.f32 %v804_v23 }
 0x402   : > { %v915_v24 = vpop.xlane.xlu1 %914 }
 0x403   : > { %1554 = vrcp.f32 %v915_v24 }
 0x405   : > { %v1553_v25 = vpop.eup %1552 }
 0x406   : > { %v806_v26 = vmul.f32 %v1553_v25, %v1545_v8  ;;  %v1030_v33 = vpop.permute.xlu1 %1029 }
 0x407   : > { %v1035_v35 = vsel %vm700_vm3, %v1030_v33, 0 }
 0x408   : > { %v807_v27 = vpack.c.bf16 %v806_v26, %v806_v26 }
 0x40a   : > { %v1025_v28 = vpop.xlane.xlu0 %1024  ;;  %1404 = vmatmul.mubr.msk.bf16.vlgmr.msra.gmra.mrb[12].mxu0 %vm638_vm2, %v807_v27 }
 0x40b   : > { %1556 = vrcp.f32 %v1025_v28  ;;  %1415 = vmatprep.mubr.msk.bf16.mxu0 %vm1777_vm0, %v1776_v0 }
 0x40d   : > { %v1555_v29 = vpop.eup %1554 }
 0x40e   : > { %v917_v30 = vmul.f32 %v1555_v29, %v1547_v13  ;;  %v920_v31 = vpop.permute.xlu0 %919 }
 0x40f   : > { %v925_v32 = vsel %vm700_vm3, %v920_v31, 0 }
 0x410   : > { %1414 = vmatpush3.bf16.msra.mxu0 %v925_v32  ;;  %v918_v34 = vpack.c.bf16 %v917_v30, %v917_v30 }
 0x411   : > { %1425 = vmatprep.subr.bf16.mxu0 %v1776_v0 }
 0x413   : > { %1416 = vmatmul.mubr.msk.bf16.vlgmr.msra.gmra.mrb[16].mxu0 %vm638_vm2, %v918_v34 }
 0x414   : > { %1426 = vmatpush3.bf16.msra.mxu0 %v1035_v35  ;;  %1427 = vmatprep.mubr.msk.bf16.mxu0 %vm1777_vm0, %v1776_v0 }
 0x415   : > { %v1557_v36 = vpop.eup %1556 }
 0x416   : > { %v1027_v37 = vmul.f32 %v1557_v36, %v1549_v15 }
 0x418   : > { %v1028_v38 = vpack.c.bf16 %v1027_v37, %v1027_v37 }
 0x41b   : > { %1428 = vmatmul.mubr.msk.bf16.vlgmr.msra.gmra.mrb[20].mxu0 %vm638_vm2, %v1028_v38 }
 0x46b   : > { %v738_v39 = vpop.f32.mrb[8].mxu0 }
 0x46c   : > { %v1393_v40 = vpop.f32.mrb[9].mxu0 }
 0x46d   : > { %v741_v41 = vpop.f32.mrb[10].mxu0 }
 0x46e   : > { %v1394_v42 = vpop.f32.mrb[11].mxu0 }
 0x4dd   : > { %v851_v44 = vpop.f32.mrb[12].mxu0 }
 0x4de   : > { %1078 = vrot.lane.b32.xlu1 %v851_v44, %s1781_s25  ;;  %v1405_v45 = vpop.f32.mrb[13].mxu0  ;;  %s1680_s25 = scalar_lea.vmem %s1679_s11, 256 }
 0x4df   : > { %v854_v46 = vpop.f32.mrb[14].mxu0  ;;  %p1682_p9 = scmp.lt.s32.totalorder %s1680_s25, %s1674_s16 }
 0x4e0   : > { %v1406_v47 = vpop.f32.mrb[15].mxu0 }
 0x4e1   : > { %p1683_p5 = por %p1682_p9, %p1681_p4 }
 0x4e3   : > { %p1684_p7 = pnand %p1683_p5, %p1677_p3 }
 0x4e6   : > { %v961_v49 = vpop.f32.mrb[16].mxu0 }
 0x4e7   : > { %1082 = vrot.lane.b32.xlu0 %v961_v49, %s1782_s20  ;;  %v1417_v50 = vpop.f32.mrb[17].mxu0 }
 0x4e8   : > { %v964_v51 = vpop.f32.mrb[18].mxu0 }
 0x4e9   : > { %v1418_v52 = vpop.f32.mrb[19].mxu0 }
 0x4ee   : > { %v1071_v53 = vpop.f32.mrb[20].mxu0 }
 0x4ef   : > { %1086 = vrot.lane.b32.xlu1 %v1071_v53, %s1783_s21  ;;  %v1429_v0 = vpop.f32.mrb[21].mxu0 }
 0x4f0   : > { %v1074_v54 = vpop.f32.mrb[22].mxu0 }
 0x4f1   : > { %v1430_v55 = vpop.f32.mrb[23].mxu0 }
 0x550   : > { %v1079_v56 = vpop.permute.xlu1 %1078 }
 0x551   : > { %v1089_v58 = vsel %vm638_vm2, %v738_v39, %v1079_v56 }
 0x559   : > { %v1083_v57 = vpop.permute.xlu0 %1082 }
 0x55a   : > { %v1090_v59 = vsel %vm478_vm1, %v1089_v58, %v1083_v57 }
 0x561   : > { %v1087_v60 = vpop.permute.xlu1 %1086 }
 0x562   : > { %v1092_v61 = vsel %vm1091_vm4, %v1090_v59, %v1087_v60 }
 0x563   : > { %v1093_v62 = vpack.c.bf16 %v1092_v61, %v1092_v61 }
 0x565   : > { %1436 = vmatmul.mubr.msk.bf16.vlgmr.msra.gmra.mrb[20].mxu1 %vm1117_vm5, %v1093_v62 }
 0x638   : > { %v1155_v1 = vpop.f32.mrb[20].mxu1 }
 0x639   : > { %v1156_v2 = vadd.f32 %v1332_v63, %v1155_v1  ;;  %v1437_v3 = vpop.f32.mrb[21].mxu1 }
 0x63a   : > { %v1158_v4 = vpop.f32.mrb[22].mxu1 }
 0x63b   : > { %v1438_v5 = vpop.f32.mrb[23].mxu1  ;;  %1161 = vst.msk [vmem:[%s457_s6] sm:$0xff] %vm1117_vm5, %v1156_v2 }
 0x63c   : > { %1687 = shalt.err (!%p1684_p7)
}
 0x63d   : > { %s1688_s2 = scalar_lea.hbm %s2176_s9, 128  ;;  %s1692_s20 = scalar_lea.hbm %s2270_s27, 256 }
 0x63e   : > { %p1689_p13 = scmp.ne.s32.totalorder %s2176_s9, %s1688_s2  ;;  %p1693_p2 = scmp.lt.u32.totalorder %s2176_s9, %s2270_s27 }
 0x63f   : > { %p1694_p12 = scmp.lt.u32.totalorder %s1692_s20, %s1688_s2  ;;  %p1696_p1 = scmp.lt.u32.totalorder %s1688_s2, %s2176_s9 }
 0x640   : > { %p1690_p8 = pnand %p1689_p13, %p2271_p6 }
 0x641   : > { %p1695_p0 = por %p1694_p12, %p1693_p2 }
 0x642   : > { %p1691_p11 = pneg %p1690_p8 }
 0x643   : > { %p1697_p10 = por %p1696_p1, %p1695_p0 }
 0x645   : > { %p1698_p3 = pnand %p1697_p10, %p1691_p11 }
 0x647   : > { %1701 = shalt.err (!%p1698_p3)
}
 0x648   : > { %1451 = dma.vmem_to_hbm [thread:$0]  (%p2271_p6), %s2178_s22, 128, %s2176_s9, %s1163_s24  }
 0x649 PF: > { %s2272_s19 = sld [smem:[#allocation16_spill]]  ;;  %s2273_s30 = sld [smem:[#allocation18_spill]] }
 0x64a   : > { %p2275_p9 = scmp.ge.s32.totalorder %s1768_s18, 2 }
 0x64f   : > { %s1189_s12 = sand.u32 1, %s2272_s19   ;;  %p2274_p4 = scmp.ne.s32.totalorder %s2273_s30, 0 }
 0x650   : > { %s1190_s6 = scalar_lea.sflag [#allocation4], %s1189_s12 }
 0x651   : > { %p1468_p5 = pnand %p2275_p9, %p2274_p4 }
 0x653   : > { %1743 = dma.done.wait (!%p1468_p5), %s1190_s6, 128  }
 0x654   : > { %1745 = vsyncadd (!%p1468_p5), %s1190_s6, 4294967168  ;;  %s30_s18 = sadd.s32 1, %s1768_s18   ;;  %s2276_s26 = sld [smem:[#allocation20_spill]] }
 0x655   : > { %p27_p7 = scmp.ge.s32.totalorder %s30_s18, 4   ;;  %s2277_s16 = sld [smem:[#allocation17_spill]] }
 0x656   : > { %s2278_s17 = sld [smem:[#allocation19_spill]]  ;;  %s2279_s13 = smov %s1752_s14 }
 0x657   : > { %s2280_s14 = smov %s1756_s15  ;;  %29 = sbr.rel (!%p27_p7) target bundleno = 14 (0xe), region = 126 }
 0x65a   : > { %s2281_s15 = smov %s2276_s26 }
 0x65e   :  { %1195 = vsyncpa [#allocation3], 1 }
 0x65f   :  { %1197 = vsyncpa [#allocation3 + $0x1], 1 }
 0x660   :  { %1198 = vsyncpa [#allocation6], 1 }
 0x661   :  { %1200 = vsyncpa [#allocation6 + $0x1], 1 }
 0x662   :  { %1201 = vsyncpa [#allocation9], 1 }
 0x663   :  { %1202 = vsyncpa [#allocation4], 1 }
 0x664   :  { %1204 = vsyncpa [#allocation4 + $0x1], 1 }

</bundles_post_ra>
